<compile_context>
chip_gen: v7x
topology: tpu7x:2x2x1
jax: 0.10.0
libtpu: 0.0.40
codegen_flags: <defaults>
</compile_context>

<pallas_src>
import functools

import jax
import jax.numpy as jnp
from jax.experimental import pallas as pl
from jax.experimental.pallas import tpu as pltpu


def _round_up(x, m):
    return (x + m - 1) // m * m


# ----------------------------------------------------------------------------
# Fused GCN-layer kernel:  out[M, F] = adj[M, K] @ (x[K, Fin] @ W[Fin, F])
# Grid = (M/tm, K/tk); K is the reduction ("arbitrary") axis.  W is pinned
# whole in VMEM (constant block index).  The output tile is resident across
# the K loop and accumulated in f32 directly.
# ----------------------------------------------------------------------------
def _gcn_layer_kernel(adj_ref, x_ref, w_ref, o_ref):
    @pl.when(pl.program_id(1) == 0)
    def _():
        o_ref[...] = jnp.zeros_like(o_ref)

    # Feature transform for this K tile (bf16 operands, f32 MXU accumulation).
    h = jnp.dot(x_ref[...], w_ref[...], preferred_element_type=jnp.float32)
    # Aggregate with the adjacency tile; accumulate into the resident f32 out.
    o_ref[...] += jnp.dot(
        adj_ref[...], h.astype(adj_ref.dtype),
        preferred_element_type=jnp.float32,
    )


@functools.partial(jax.jit, static_argnames=("tm", "tk"))
def _gcn_layer_call(adj, x, w, *, tm, tk):
    M, K = adj.shape
    K2, Fin = x.shape
    Fin2, F = w.shape
    assert K == K2 and Fin == Fin2, (adj.shape, x.shape, w.shape)

    grid = (M // tm, K // tk)

    # Explicit VMEM budget: double-buffered adj / x tiles + pinned W (bf16)
    # plus the resident f32 output tile (double-buffered), with headroom.
    in_itemsize = jnp.dtype(adj.dtype).itemsize
    footprint = (2 * (tm * tk + tk * Fin + Fin * F) * in_itemsize
                 + 2 * tm * F * 4)
    vmem_limit = int(min(max(4 * footprint, 8 * 1024 * 1024),
                         64 * 1024 * 1024))

    return pl.pallas_call(
        _gcn_layer_kernel,
        out_shape=jax.ShapeDtypeStruct((M, F), jnp.float32),
        grid_spec=pltpu.PrefetchScalarGridSpec(
            num_scalar_prefetch=0,
            grid=grid,
            in_specs=[
                pl.BlockSpec((tm, tk), lambda i, k: (i, k)),    # adj tile
                pl.BlockSpec((tk, Fin), lambda i, k: (k, 0)),   # x K-tile
                pl.BlockSpec((Fin, F), lambda i, k: (0, 0)),    # W, pinned
            ],
            out_specs=pl.BlockSpec((tm, F), lambda i, k: (i, 0)),
        ),
        compiler_params=pltpu.CompilerParams(
            dimension_semantics=("parallel", "arbitrary"),
            vmem_limit_bytes=vmem_limit,
        ),
    )(adj, x, w)


# ----------------------------------------------------------------------------
# GraphConvolution layer wrapper:  act( adj @ (x @ W) )  — one pallas_call.
# Default act is identity, matching the PyTorch defaults (act=λx:x, 'None').
# ----------------------------------------------------------------------------
def graph_convolution(x, adj, weight, act=lambda v: v,
                      *, compute_dtype=jnp.bfloat16):
    M, K = adj.shape            # square adjacency: M == K == num_nodes
    _, Fin = x.shape
    _, F = weight.shape

    # Zero-pad to 128 multiples (zero rows/cols keep the aggregation exact).
    pM, pK = _round_up(M, 128), _round_up(K, 128)
    pFin, pF = _round_up(Fin, 128), _round_up(F, 128)

    adj_p = jnp.pad(adj, ((0, pM - M), (0, pK - K))).astype(compute_dtype)
    x_p = jnp.pad(x, ((0, pK - K), (0, pFin - Fin))).astype(compute_dtype)
    w_p = jnp.pad(weight, ((0, pFin - Fin), (0, pF - F))).astype(compute_dtype)

    # M tile: prefer 256, but keep >=2 parallel M tiles when possible so both
    # v7x TensorCores get work (no effect on single-TC v5e/v6e).
    if pM % 256 == 0 and pM // 256 >= 2:
        tm = 256
    else:
        tm = 128
    # Reduction tile: cover as much of K per grid step as fits comfortably.
    tk = max(t for t in (512, 256, 128) if pK % t == 0)

    out = _gcn_layer_call(adj_p, x_p, w_p, tm=tm, tk=tk)
    return act(out[:M, :F])


class FastGAEPallas:
    """JAX/Pallas port of FastGAE (layers=2, mode='None', act=identity)."""

    def __init__(self, input_size, emb_size, key, layers=2):
        self.input_size = input_size
        self.emb_size = emb_size
        keys = jax.random.split(key, layers)

        def glorot(k, fan_in, fan_out):
            limit = jnp.sqrt(6.0 / (fan_in + fan_out))
            return jax.random.uniform(
                k, (fan_in, fan_out), jnp.float32, -limit, limit
            )

        # encoder: input_size -> emb_size
        self.w_encoder = glorot(keys[0], input_size, emb_size)
        # medium: empty for layers=2 (range(layers-2))
        self.w_medium = [
            glorot(keys[1 + i], emb_size, emb_size) for i in range(layers - 2)
        ]
        # mean head: emb_size -> emb_size, act = identity
        self.w_mean = glorot(keys[-1], emb_size, emb_size)

    def forward(self, adj, x):
        support = graph_convolution(x, adj, self.w_encoder)      # encoder
        for w in self.w_medium:                                  # medium ([])
            support = graph_convolution(support, adj, w)
        support = graph_convolution(support, adj, self.w_mean)   # mean head
        return support


if __name__ == "__main__":
    key = jax.random.PRNGKey(0)
    k_adj, k_x, k_params = jax.random.split(key, 3)

    # Small shapes consistent with the module's forward.
    N = 256            # number of graph nodes
    INPUT_SIZE = 128   # input feature size
    EMB_SIZE = 128     # embedding size

    # Deterministic synthetic inputs: symmetric dense "adjacency" + features.
    a = jax.random.uniform(k_adj, (N, N), jnp.float32)
    adj = 0.5 * (a + a.T)
    x = jax.random.uniform(k_x, (N, INPUT_SIZE), jnp.float32)

    model = FastGAEPallas(INPUT_SIZE, EMB_SIZE, k_params, layers=2)

    out = model.forward(adj, x)
    out = jax.block_until_ready(out)
    assert out.shape == (N, EMB_SIZE) and out.dtype == jnp.float32

    # Cross-check against plain XLA f32 reference (kernel uses bf16 operands
    # with f32 accumulation -> compare with a relative-Frobenius tolerance).
    ref = adj @ ((adj @ (x @ model.w_encoder)) @ model.w_mean)
    rel_err = float(jnp.linalg.norm(out - ref) / jnp.linalg.norm(ref))
    assert rel_err < 3e-2, rel_err

    print("KERNEL_OK")
</pallas_src>

<mosaic_0001>
module attributes {stable_mosaic.version = 11 : i64} {
  func.func @_gcn_layer_kernel(%arg0: i32, %arg1: i32, %arg2: memref<128x256xbf16, #tpu.memory_space<vmem>>, %arg3: memref<256x128xbf16, #tpu.memory_space<vmem>>, %arg4: memref<128x128xbf16, #tpu.memory_space<vmem>>, %arg5: memref<128x128xf32, #tpu.memory_space<vmem>>) attributes {dimension_semantics = [#tpu.dimension_semantics<parallel>, #tpu.dimension_semantics<arbitrary>], iteration_bounds = array<i64: 2, 1>, scalar_prefetch = 0 : i64, scratch_operands = 0 : i64, tpu.core_type = #tpu.core_type<tc>, window_params = [{transform_indices = @transform_0, window_bounds = array<i64: 128, 256>}, {transform_indices = @transform_1, window_bounds = array<i64: 256, 128>}, {pipeline_mode = #tpu.pipeline_mode<synchronous>, transform_indices = @transform_2, window_bounds = array<i64: 128, 128>}, {transform_indices = @transform_3, window_bounds = array<i64: 128, 128>}]} {
    %c0_i32 = arith.constant 0 : i32
    %0 = arith.cmpi eq, %arg1, %c0_i32 : i32
    %1 = arith.extui %0 : i1 to i32
    %c0_i32_0 = arith.constant 0 : i32
    %2 = arith.cmpi ne, %1, %c0_i32_0 : i32
    scf.if %2 {
      %cst_11 = arith.constant 0.000000e+00 : f32
      %12 = vector.broadcast %cst_11 : f32 to vector<128x128xf32>
      %c0_12 = arith.constant 0 : index
      %c0_13 = arith.constant 0 : index
      %13 = vector.load %arg5[%c0_12, %c0_13] : memref<128x128xf32, #tpu.memory_space<vmem>>, vector<128x128xf32>
      tpu.vector_store %arg5[%c0_12, %c0_13], %12 {strides = array<i32>} : memref<128x128xf32, #tpu.memory_space<vmem>>, vector<128x128xf32>,
    } else {
    }
    %c0 = arith.constant 0 : index
    %c0_1 = arith.constant 0 : index
    %3 = vector.load %arg3[%c0, %c0_1] : memref<256x128xbf16, #tpu.memory_space<vmem>>, vector<256x128xbf16>
    %c0_2 = arith.constant 0 : index
    %c0_3 = arith.constant 0 : index
    %4 = vector.load %arg4[%c0_2, %c0_3] : memref<128x128xbf16, #tpu.memory_space<vmem>>, vector<128x128xbf16>
    %cst = arith.constant dense<0.000000e+00> : vector<256x128xf32>
    %5 = tpu.matmul %3, %4, %cst {dimension_numbers = #tpu.dot_dimension_numbers<[1], [0], [0], [1], [0, 0, 1, 1], [], []>} : vector<256x128xbf16>, vector<128x128xbf16>, vector<256x128xf32> -> vector<256x128xf32>
    %c0_4 = arith.constant 0 : index
    %c0_5 = arith.constant 0 : index
    %6 = vector.load %arg5[%c0_4, %c0_5] : memref<128x128xf32, #tpu.memory_space<vmem>>, vector<128x128xf32>
    %c0_6 = arith.constant 0 : index
    %c0_7 = arith.constant 0 : index
    %7 = vector.load %arg2[%c0_6, %c0_7] : memref<128x256xbf16, #tpu.memory_space<vmem>>, vector<128x256xbf16>
    %8 = arith.truncf %5 : vector<256x128xf32> to vector<256x128xbf16>
    %cst_8 = arith.constant dense<0.000000e+00> : vector<128x128xf32>
    %9 = tpu.matmul %7, %8, %cst_8 {dimension_numbers = #tpu.dot_dimension_numbers<[1], [0], [0], [1], [0, 0, 1, 1], [], []>} : vector<128x256xbf16>, vector<256x128xbf16>, vector<128x128xf32> -> vector<128x128xf32>
    %10 = arith.addf %6, %9 : vector<128x128xf32>
    %c0_9 = arith.constant 0 : index
    %c0_10 = arith.constant 0 : index
    %11 = vector.load %arg5[%c0_9, %c0_10] : memref<128x128xf32, #tpu.memory_space<vmem>>, vector<128x128xf32>
    tpu.vector_store %arg5[%c0_9, %c0_10], %10 {strides = array<i32>} : memref<128x128xf32, #tpu.memory_space<vmem>>, vector<128x128xf32>,
    return
  }
  func.func @transform_0(%arg0: i32, %arg1: i32) -> (i32, i32) {
    %c0_i32 = arith.constant 0 : i32
    return %arg0, %arg1 : i32, i32
  }
  func.func @transform_1(%arg0: i32, %arg1: i32) -> (i32, i32) {
    %c0_i32 = arith.constant 0 : i32
    %c0_i32_0 = arith.constant 0 : i32
    return %arg1, %c0_i32 : i32, i32
  }
  func.func @transform_2(%arg0: i32, %arg1: i32) -> (i32, i32) {
    %c0_i32 = arith.constant 0 : i32
    %c0_i32_0 = arith.constant 0 : i32
    %c0_i32_1 = arith.constant 0 : i32
    return %c0_i32, %c0_i32_0 : i32, i32
  }
  func.func @transform_3(%arg0: i32, %arg1: i32) -> (i32, i32) {
    %c0_i32 = arith.constant 0 : i32
    %c0_i32_0 = arith.constant 0 : i32
    return %arg0, %c0_i32 : i32, i32
  }
}

</mosaic_0001>

<bundles_post_ra>
// kernel: _gcn_layer_call.1
= control target key start
LH: loop header
LB: loop body
LE: loop exit
PB: predicated region body
PF: predicated region fallthrough
CT: control target
= control target key end

     0   :  { %8 = vsyncpa [#allocation3], 0  ;;  %s1834_s0 = inlined_call_operand.hbm [shape: bf16[256,256], index: 0, kind: input, shape index: {}]   ;;  %s1835_s1 = inlined_call_operand.hbm [shape: bf16[256,128], index: 1, kind: input, shape index: {}]   ;;  %s1836_s2 = inlined_call_operand.hbm [shape: bf16[128,128], index: 2, kind: input, shape index: {}]   ;;  %s1837_s3 = inlined_call_operand.hbm [shape: f32[256,128], index: 3, kind: output, shape index: {}]  }
   0x1   :  { %10 = vsyncpa [#allocation3 + $0x1], 0 }
   0x2   :  { %11 = vsyncpa [#allocation6], 0 }
   0x3   :  { %12 = vsyncpa [#allocation4], 0 }
   0x4   :  { %14 = vsyncpa [#allocation4 + $0x1], 0  ;;  %s1538_s12 = smov 0   ;;  %s1540_s13 = smov 0  }
   0x5   :  { %s1542_s14 = smov 0   ;;  %s1544_s15 = smov 0  }
   0x6   :  { %s1546_s16 = smov 0   ;;  %s1548_s17 = smov 0  }
   0x7 LB: > { %s997_s18 = sadd.s32 4294967295, %s1506_s17   ;;  %s998_s19 = sadd.s32 4294967294, %s1506_s17   ;;  %s1506_s17 = sphi %s1548_s17, %s20_s17   ;;  %s1502_s16 = sphi %s1546_s16, %s1859_s16   ;;  %s1498_s15 = sphi %s1544_s15, %s1858_s15   ;;  %s1494_s14 = sphi %s1542_s14, %s1857_s14   ;;  %s1490_s13 = sphi %s1540_s13, %s1856_s13   ;;  %s1486_s12 = sphi %s1538_s12, %s1855_s12  }
   0x8   : > { %p54_p0 = scmp.ne.s32.totalorder %s1490_s13, %s1486_s12  ;;  %p1572_p1 = scmp.eq.s32.totalorder %s997_s18, 0 }
   0x9   : > { %p1576_p2 = scmp.eq.s32.totalorder %s997_s18, 1  ;;  %p131_p3 = scmp.eq.s32.totalorder %s998_s19, 1 }
   0xa   : > { %s1842_s20 = scalar_select %p1572_p1, 1, 0 }
   0xb   : > { %p1582_p4 = por %p1572_p1, %p54_p0  ;;  %p999_p5 = scmp.ge.s32.totalorder %s1506_s17, 1 }
   0xc   : > { %p1587_p6 = por %p131_p3, %p54_p0  ;;  %p138_p7 = scmp.lt.s32.totalorder %s1506_s17, 3 }
   0xd   : > { %s1844_s22 = scalar_select %p1582_p4, 1, 0 }
   0xe   : > { %s1845_s23 = scalar_select %p1587_p6, 1, 0 }
   0xf   : > { %p1592_p8 = pnand %p999_p5, %p138_p7  ;;  %s1508_s25 = smov [#allocation5]  }
  0x10   : > { %s153_s26 = sshll.u32 %s1508_s25, 4  ;;  %s1509_s28 = smov [#allocation7]   ;;  %s1596_s26 = int_to_ptr.vmem [resolvable:$true] %s153_s26 }
  0x11   : > { %p1208_p9 = pneg %p1592_p8  ;;  %s166_s29 = sshll.u32 %s1509_s28, 4  ;;  %s1607_s29 = int_to_ptr.vmem [resolvable:$true] %s166_s29 }
  0x12   : > { %s1334_s5 = scalar_lea.hbm %s1835_s1, 2048 }
  0x13   : > { %p1603_p11 = pnand %p1208_p9, %p1572_p1  ;;  %p1335_p12 = scmp.ne.s32.totalorder %s1835_s1, %s1334_s5 }
  0x14   : > { %p1341_p5 = scmp.lt.u32.totalorder %s1334_s5, %s1835_s1 }
  0x15   : > { %p1336_p13 = pneg %p1603_p11 }
  0x17   : > { %p1337_p0 = pnand %p1336_p13, %p1335_p12 }
  0x19   : > { %p1338_p3 = pneg %p1337_p0 }
  0x1b   : > { %p1343_p7 = pnand %p1341_p5, %p1338_p3 }
  0x1d   : > { %1346 = shalt.err (!%p1343_p7)
}
  0x1e   : > { %s1347_s10 = scalar_lea.vmem %s1596_s26, 2048  ;;  %p1355_p1 = scmp.lt.s32.totalorder %s1596_s26, %s1596_s26 }
  0x1f   : > { %p1348_p9 = scmp.ne.s32.totalorder %s1596_s26, %s1347_s10  ;;  %p1356_p12 = scmp.lt.s32.totalorder %s1347_s10, %s1347_s10 }
  0x21   : > { %p1350_p10 = pnand %p1348_p9, %p1336_p13  ;;  %p1357_p0 = por %p1356_p12, %p1355_p1 }
  0x23   : > { %p1351_p6 = pneg %p1350_p10 }
  0x25   : > { %p1358_p4 = pnand %p1357_p0, %p1351_p6 }
  0x27   : > { %1361 = shalt.err (!%p1358_p4)
}
  0x28   : > { %s1510_s11 = smov 64   ;;  %s1511_s18 = smov 4  }
  0x29   : > { %1211 = dma.hbm_to_vmem [thread:$0]  (!%p1603_p11), %s1835_s1, 2048, %s1596_s26, [#allocation6], %s1510_s11, %s1510_s11, %s1511_s18  }
  0x2a   : > { %s1362_s4 = scalar_lea.hbm %s1836_s2, 1024 }
  0x2b   : > { %p1363_p1 = scmp.ne.s32.totalorder %s1836_s2, %s1362_s4  ;;  %p1369_p10 = scmp.lt.u32.totalorder %s1362_s4, %s1836_s2 }
  0x2d   : > { %p1365_p4 = pnand %p1363_p1, %p1336_p13 }
  0x2f   : > { %p1366_p6 = pneg %p1365_p4 }
  0x31   : > { %p1371_p3 = pnand %p1369_p10, %p1366_p6 }
  0x33   : > { %1374 = shalt.err (!%p1371_p3)
}
  0x34   : > { %s1375_s26 = scalar_lea.vmem %s1607_s29, 1024  ;;  %p1383_p12 = scmp.lt.s32.totalorder %s1607_s29, %s1607_s29 }
  0x35   : > { %p1376_p5 = scmp.ne.s32.totalorder %s1607_s29, %s1375_s26  ;;  %p1384_p0 = scmp.lt.s32.totalorder %s1375_s26, %s1375_s26 }
  0x37   : > { %p1378_p7 = pnand %p1376_p5, %p1336_p13  ;;  %p1385_p1 = por %p1384_p0, %p1383_p12 }
  0x39   : > { %p1379_p9 = pneg %p1378_p7 }
  0x3b   : > { %p1386_p4 = pnand %p1385_p1, %p1379_p9 }
  0x3d   : > { %1389 = shalt.err (!%p1386_p4)
}
  0x3e   : > { %1214 = dma.hbm_to_vmem [thread:$0]  (!%p1603_p11), %s1836_s2, 1024, %s1607_s29, [#allocation6], %s1510_s11, %s1510_s11, %s1511_s18  }
  0x3f   : > { %s32_s19 = sadd.s32 1, %s1502_s16  ;;  %s41_s25 = sadd.s32 1, %s1494_s14 }
  0x40   : > { %p34_p13 = scmp.ge.s32.totalorder %s32_s19, 2  ;;  %p48_p6 = scmp.ne.s32.totalorder %s1494_s14, %s1490_s13 }
  0x41   : > { %p49_p10 = scmp.eq.s32.totalorder %s1506_s17, 0  ;;  %p1225_p3 = scmp.lt.s32.totalorder %s1506_s17, 2 }
  0x42   : > { %s1861_s19 = smov (%p34_p13, %s32_s19), 0  ;;  %p1671_p7 = por %p1576_p2, %p48_p6 }
  0x43   : > { %p50_p5 = por %p49_p10, %p48_p6  ;;  %s36_s28 = ssub.s32 %s1502_s16, %s1861_s19 }
  0x44   : > { %s1848_s27 = scalar_select %p1671_p7, 1, 0 }
  0x45   : > { %s180_s30 = sand.u32 1, %s1494_s14   ;;  %p39_p9 = scmp.eq.s32.totalorder %s36_s28, 0 }
  0x46   : > { %s1003_s29 = sshll.u32 %s180_s30, 7  ;;  %s1058_s11 = sshll.u32 %s1502_s16, 11 }
  0x47   : > { %s1680_s18 = scalar_select %p39_p9, %s1494_s14, %s41_s25  }
  0x48   : > { %s1685_s6 = scalar_lea.hbm %s1834_s0, %s1058_s11  ;;  %s184_s21 = scalar_lea.vmem [#allocation2], %s1003_s29 }
  0x49   : > { %s194_s7 = sshll.u32 %s184_s21, 4  ;;  %p1689_p2 = pnand %p1225_p3, %p50_p5  ;;  %s1693_s7 = int_to_ptr.vmem [resolvable:$true] %s194_s7 }
  0x4a   : > { %s1695_s26 = scalar_lea.sflag [#allocation3], %s180_s30  ;;  %s1390_s9 = scalar_lea.hbm %s1685_s6, 2048 }
  0x4b   : > { %p1391_p11 = scmp.ne.s32.totalorder %s1685_s6, %s1390_s9  ;;  %p1392_p12 = pneg %p1689_p2 }
  0x4c   : > { %s1395_s28 = scalar_lea.hbm %s1834_s0, 4096  ;;  %p1396_p4 = scmp.lt.u32.totalorder %s1685_s6, %s1834_s0 }
  0x4d   : > { %p1393_p0 = pnand %p1392_p12, %p1391_p11  ;;  %p1397_p13 = scmp.lt.u32.totalorder %s1395_s28, %s1390_s9 }
  0x4e   : > { %p1399_p10 = scmp.lt.u32.totalorder %s1390_s9, %s1685_s6 }
  0x4f   : > { %p1394_p1 = pneg %p1393_p0  ;;  %p1398_p6 = por %p1397_p13, %p1396_p4 }
  0x51   : > { %p1400_p3 = por %p1399_p10, %p1398_p6 }
  0x53   : > { %p1401_p5 = pnand %p1400_p3, %p1394_p1 }
  0x55   : > { %1404 = shalt.err (!%p1401_p5)
}
  0x56   : > { %s1405_s30 = scalar_lea.vmem %s1693_s7, 2048  ;;  %s1512_s4 = smov [#allocation2]  }
  0x57   : > { %p1406_p9 = scmp.ne.s32.totalorder %s1693_s7, %s1405_s30  ;;  %s1410_s5 = sshll.u32 %s1512_s4, 4  ;;  %s1411_s5 = int_to_ptr.vmem [resolvable:$false] %s1410_s5 }
  0x58   : > { %s1412_s21 = scalar_lea.vmem %s1411_s5, 4096  ;;  %p1413_p7 = scmp.lt.s32.totalorder %s1693_s7, %s1411_s5 }
  0x59   : > { %p1408_p11 = pnand %p1406_p9, %p1392_p12  ;;  %p1414_p4 = scmp.lt.s32.totalorder %s1412_s21, %s1405_s30 }
  0x5b   : > { %p1409_p0 = pneg %p1408_p11  ;;  %p1415_p13 = por %p1414_p4, %p1413_p7 }
  0x5d   : > { %p1416_p6 = pnand %p1415_p13, %p1409_p0 }
  0x5f   : > { %1419 = shalt.err (!%p1416_p6)
}
  0x60   : > { %s1513_s9 = smov 128   ;;  %s1514_s10 = smov 8  }
  0x61   : > { %1218 = dma.hbm_to_vmem [thread:$0]  (!%p1689_p2), %s1685_s6, 2048, %s1693_s7, %s1695_s26, %s1513_s9, %s1513_s9, %s1514_s10  }
  0x62   : > { %206 = sbr.rel (%p1592_p8) target bundleno = 711 (0x2c7), region = 32  ;;  %s1726_s25 = sand.u32 (!%p1592_p8), 1, %s1490_s13  }
  0x63   : > { %s1008_s28 = sshll.u32 (!%p1592_p8), %s1726_s25, 7  ;;  %s209_s29 = scalar_lea.sflag (!%p1592_p8), [#allocation3], %s1726_s25 }
  0x64   : > { %s1732_s11 = scalar_lea.vmem (!%p1592_p8), [#allocation2], %s1008_s28  ;;  %p1850_p7 = scmp.ne.s32.totalorder (!%p1592_p8), %s1844_s22, 0 }
  0x69   : > { %1473 = dma.done.wait (%p1850_p7), %s209_s29, 2048  }
  0x6a   : > { %1475 = vsyncadd (%p1850_p7), %s209_s29, 4294965248  ;;  %p1851_p2 = scmp.ne.s32.totalorder %s1842_s20, 0 }
  0x6c   : > { %1477 = dma.done.wait (%p1851_p2), [#allocation6], 3072  }
  0x6d   : > { %1479 = vsyncadd (%p1851_p2), [#allocation6], 4294964224  ;;  %v1286_v0 = vld [vmem:[#allocation7] sm:$0xff]   ;;  %v1287_v1 = vld [vmem:[#allocation7 + $0x8] sm:$0xff]   ;;  %s1760_s20 = scalar_lea.vmem [#allocation8], %s1008_s28  ;;  %s1059_s22 = sshll.u32 %s1498_s15, 11 }
  0x6e   : > { %1148 = vmatprep.subr.bf16.mxu0 %v1286_v0  ;;  %v1288_v2 = vld [vmem:[#allocation7 + $0x10] sm:$0xff]   ;;  %v1289_v3 = vld [vmem:[#allocation7 + $0x18] sm:$0xff]   ;;  %v1294_v4 = vld [vmem:[#allocation5] sm:$0xff]   ;;  %s892_s24 = sshll.u32 %s1760_s20, 4  ;;  %s1781_s8 = scalar_lea.hbm %s1837_s3, %s1059_s22  ;;  %s1783_s24 = int_to_ptr.vmem [resolvable:$true] %s892_s24 }
  0x6f   : > { %1149 = vmatpush3.bf16.msra.mxu0 %v1286_v0  ;;  %1164 = vmatprep.mubr.bf16.mxu0 %v1294_v4  ;;  %v1290_v5 = vld [vmem:[#allocation7 + $0x20] sm:$0xff]   ;;  %v1291_v6 = vld [vmem:[#allocation7 + $0x28] sm:$0xff]   ;;  %v1292_v7 = vld [vmem:[#allocation7 + $0x30] sm:$0xff]   ;;  %s879_s26 = scalar_lea.sflag [#allocation4], %s1726_s25  ;;  %s1420_s30 = scalar_lea.vmem %s1783_s24, 2048 }
  0x70   : > { %1150 = vmatprep.subr.bf16.mxu0 %v1287_v1  ;;  %v1293_v8 = vld [vmem:[#allocation7 + $0x38] sm:$0xff]   ;;  %v1295_v9 = vld [vmem:[#allocation5 + $0x8] sm:$0xff]   ;;  %v1296_v10 = vld [vmem:[#allocation5 + $0x10] sm:$0xff]   ;;  %p1421_p8 = scmp.ne.s32.totalorder %s1783_s24, %s1420_s30  ;;  %p1852_p12 = scmp.ne.s32.totalorder %s1848_s27, 0 }
  0x71   : > { %v1297_v11 = vld [vmem:[#allocation5 + $0x18] sm:$0xff]   ;;  %v1298_v12 = vld [vmem:[#allocation5 + $0x20] sm:$0xff]   ;;  %v1299_v13 = vld [vmem:[#allocation5 + $0x28] sm:$0xff]   ;;  %s1515_s15 = smov [#allocation8]  }
  0x72   : > { %v1300_v14 = vld [vmem:[#allocation5 + $0x30] sm:$0xff]   ;;  %v1301_v15 = vld [vmem:[#allocation5 + $0x38] sm:$0xff]   ;;  %v1302_v16 = vld [vmem:[#allocation5 + $0x40] sm:$0xff]   ;;  %p1422_p1 = pnand %p1421_p8, %p1852_p12  ;;  %s1424_s4 = sshll.u32 %s1515_s15, 4  ;;  %s1425_s4 = int_to_ptr.vmem [resolvable:$false] %s1424_s4 }
  0x73   : > { %1151 = vmatpush3.bf16.msra.mxu0 %v1287_v1  ;;  %v1303_v17 = vld [vmem:[#allocation5 + $0x48] sm:$0xff]   ;;  %v1304_v18 = vld [vmem:[#allocation5 + $0x50] sm:$0xff]   ;;  %v1305_v19 = vld [vmem:[#allocation5 + $0x58] sm:$0xff]   ;;  %s1426_s5 = scalar_lea.vmem %s1425_s4, 4096  ;;  %p1427_p3 = scmp.lt.s32.totalorder %s1783_s24, %s1425_s4 }
  0x74   : > { %1152 = vmatprep.subr.bf16.mxu0 %v1288_v2  ;;  %v1306_v20 = vld [vmem:[#allocation5 + $0x60] sm:$0xff]   ;;  %v1307_v21 = vld [vmem:[#allocation5 + $0x68] sm:$0xff]   ;;  %v1308_v22 = vld [vmem:[#allocation5 + $0x70] sm:$0xff]   ;;  %p1423_p10 = pneg %p1422_p1  ;;  %p1428_p5 = scmp.lt.s32.totalorder %s1426_s5, %s1420_s30 }
  0x75   : > { %v1309_v23 = vld [vmem:[#allocation5 + $0x78] sm:$0xff]   ;;  %v1312_v24 = vld [vmem:[%s1732_s11 + $0x4] ss:$8 sps:$4 sm:$0xff]  }
  0x76   : > { %781 = vmatprep.mubr.bf16.mxu1 %v1312_v24  ;;  %p1429_p9 = por %p1428_p5, %p1427_p3 }
  0x77   : > { %1153 = vmatpush3.bf16.msra.mxu0 %v1288_v2 }
  0x78   : > { %1154 = vmatprep.subr.bf16.mxu0 %v1289_v3  ;;  %p1430_p11 = pnand %p1429_p9, %p1423_p10 }
  0x7b   : > { %1155 = vmatpush3.bf16.msra.mxu0 %v1289_v3 }
  0x7c   : > { %1156 = vmatprep.subr.bf16.mxu0 %v1290_v5 }
  0x7f   : > { %1157 = vmatpush3.bf16.msra.mxu0 %v1290_v5 }
  0x80   : > { %1158 = vmatprep.subr.bf16.mxu0 %v1291_v6 }
  0x83   : > { %1159 = vmatpush3.bf16.msra.mxu0 %v1291_v6 }
  0x84   : > { %1160 = vmatprep.subr.bf16.mxu0 %v1292_v7 }
  0x87   : > { %1161 = vmatpush3.bf16.msra.mxu0 %v1292_v7 }
  0x88   : > { %1162 = vmatprep.subr.bf16.mxu0 %v1293_v8 }
  0x8b   : > { %1163 = vmatpush3.bf16.msra.mxu0 %v1293_v8 }
  0x8e   : > { %1165 = vmatmul.mubr.bf16.vlgmr.msra.gmra.mrb[0].mxu0 %v1295_v9  ;;  %v1310_v9 = vld [vmem:[%s1732_s11] ss:$8 sps:$4 sm:$0xff]  }
  0x8f   : > { %1168 = vmatprep.mubr.bf16.mxu0 %v1296_v10  ;;  %v1313_v10 = vld [vmem:[%s1732_s11 + $0x14] ss:$8 sps:$4 sm:$0xff]  }
  0x96   : > { %1169 = vmatmul.mubr.bf16.gmra.mrb[4].mxu0 %v1297_v11  ;;  %v1315_v11 = vld [vmem:[%s1732_s11 + $0x10] ss:$8 sps:$4 sm:$0xff]  }
  0x97   : > { %1172 = vmatprep.mubr.bf16.mxu0 %v1298_v12  ;;  %v1316_v12 = vld [vmem:[%s1732_s11 + $0x24] ss:$8 sps:$4 sm:$0xff]  }
  0x9e   : > { %1173 = vmatmul.mubr.bf16.gmra.mrb[8].mxu0 %v1299_v13  ;;  %v1318_v13 = vld [vmem:[%s1732_s11 + $0x20] ss:$8 sps:$4 sm:$0xff]  }
  0x9f   : > { %1176 = vmatprep.mubr.bf16.mxu0 %v1300_v14  ;;  %v1319_v14 = vld [vmem:[%s1732_s11 + $0x34] ss:$8 sps:$4 sm:$0xff]  }
  0xa6   : > { %1177 = vmatmul.mubr.bf16.gmra.mrb[12].mxu0 %v1301_v15  ;;  %v1321_v15 = vld [vmem:[%s1732_s11 + $0x30] ss:$8 sps:$4 sm:$0xff]  }
  0xa7   : > { %1180 = vmatprep.mubr.bf16.mxu0 %v1302_v16  ;;  %v1322_v16 = vld [vmem:[%s1732_s11 + $0x44] ss:$8 sps:$4 sm:$0xff]  }
  0xae   : > { %1181 = vmatmul.mubr.bf16.gmra.mrb[16].mxu0 %v1303_v17  ;;  %v1324_v17 = vld [vmem:[%s1732_s11 + $0x40] ss:$8 sps:$4 sm:$0xff]  }
  0xaf   : > { %1184 = vmatprep.mubr.bf16.mxu0 %v1304_v18  ;;  %v1325_v18 = vld [vmem:[%s1732_s11 + $0x54] ss:$8 sps:$4 sm:$0xff]  }
  0xb6   : > { %1185 = vmatmul.mubr.bf16.gmra.mrb[20].mxu0 %v1305_v19  ;;  %v1327_v19 = vld [vmem:[%s1732_s11 + $0x50] ss:$8 sps:$4 sm:$0xff]  }
  0xb7   : > { %1188 = vmatprep.mubr.bf16.mxu0 %v1306_v20  ;;  %v1328_v20 = vld [vmem:[%s1732_s11 + $0x64] ss:$8 sps:$4 sm:$0xff]  }
  0xbe   : > { %1189 = vmatmul.mubr.bf16.gmra.mrb[24].mxu0 %v1307_v21  ;;  %v1330_v21 = vld [vmem:[%s1732_s11 + $0x60] ss:$8 sps:$4 sm:$0xff]  }
  0xbf   : > { %1192 = vmatprep.mubr.bf16.mxu0 %v1308_v22  ;;  %v1331_v22 = vld [vmem:[%s1732_s11 + $0x74] ss:$8 sps:$4 sm:$0xff]  }
  0xc6   : > { %1193 = vmatmul.mubr.bf16.gmra.mrb[28].mxu0 %v1309_v23  ;;  %v1333_v23 = vld [vmem:[%s1732_s11 + $0x70] ss:$8 sps:$4 sm:$0xff]  }
 0x161   : > { %v1166_v25 = vpop.f32.mrb[0].mxu0 }
 0x162   : > { %v494_v26 = vpop.f32.mrb[1].mxu0 }
 0x163   : > { %v1167_v27 = vpop.f32.mrb[2].mxu0 }
 0x164   : > { %v654_v28 = vpack.c.bf16 %v1167_v27, %v1166_v25  ;;  %v497_v29 = vpop.f32.mrb[3].mxu0 }
 0x165   : > { %v653_v30 = vpack.c.bf16 %v497_v29, %v494_v26 }
 0x169   : > { %v1170_v31 = vpop.f32.mrb[4].mxu0 }
 0x16a   : > { %v510_v32 = vpop.f32.mrb[5].mxu0 }
 0x16b   : > { %v1171_v33 = vpop.f32.mrb[6].mxu0 }
 0x16c   : > { %v656_v34 = vpack.c.bf16 %v1171_v33, %v1170_v31  ;;  %v513_v35 = vpop.f32.mrb[7].mxu0 }
 0x16d   : > { %v655_v36 = vpack.c.bf16 %v513_v35, %v510_v32 }
 0x171   : > { %v1174_v37 = vpop.f32.mrb[8].mxu0 }
 0x172   : > { %v526_v38 = vpop.f32.mrb[9].mxu0 }
 0x173   : > { %v1175_v39 = vpop.f32.mrb[10].mxu0 }
 0x174   : > { %v658_v40 = vpack.c.bf16 %v1175_v39, %v1174_v37  ;;  %v529_v41 = vpop.f32.mrb[11].mxu0 }
 0x175   : > { %v657_v42 = vpack.c.bf16 %v529_v41, %v526_v38 }
 0x179   : > { %v1178_v43 = vpop.f32.mrb[12].mxu0 }
 0x17a   : > { %v542_v44 = vpop.f32.mrb[13].mxu0 }
 0x17b   : > { %v1179_v45 = vpop.f32.mrb[14].mxu0 }
 0x17c   : > { %v660_v46 = vpack.c.bf16 %v1179_v45, %v1178_v43  ;;  %v545_v47 = vpop.f32.mrb[15].mxu0 }
 0x17d   : > { %v659_v48 = vpack.c.bf16 %v545_v47, %v542_v44 }
 0x181   : > { %v1182_v49 = vpop.f32.mrb[16].mxu0 }
 0x182   : > { %v558_v50 = vpop.f32.mrb[17].mxu0 }
 0x183   : > { %v1183_v51 = vpop.f32.mrb[18].mxu0 }
 0x184   : > { %v662_v52 = vpack.c.bf16 %v1183_v51, %v1182_v49  ;;  %v561_v53 = vpop.f32.mrb[19].mxu0 }
 0x185   : > { %v661_v54 = vpack.c.bf16 %v561_v53, %v558_v50 }
 0x187   : > { %1084 = vmatprep.subr.bf16.mxu1 %v661_v54 }
 0x188   : > { %1085 = vmatpush3.bf16.msra.mxu1 %v653_v30 }
 0x189   : > { %v1186_v55 = vpop.f32.mrb[20].mxu0  ;;  %1086 = vmatprep.subr.bf16.mxu1 %v662_v52 }
 0x18a   : > { %v574_v56 = vpop.f32.mrb[21].mxu0 }
 0x18b   : > { %v1187_v57 = vpop.f32.mrb[22].mxu0 }
 0x18c   : > { %v664_v58 = vpack.c.bf16 %v1187_v57, %v1186_v55  ;;  %v577_v59 = vpop.f32.mrb[23].mxu0  ;;  %1087 = vmatpush3.bf16.msra.mxu1 %v654_v28 }
 0x18d   : > { %v663_v60 = vpack.c.bf16 %v577_v59, %v574_v56 }
 0x18f   : > { %1088 = vmatprep.subr.bf16.mxu1 %v663_v60 }
 0x190   : > { %1089 = vmatpush3.bf16.msra.mxu1 %v655_v36 }
 0x191   : > { %v1190_v61 = vpop.f32.mrb[24].mxu0  ;;  %1090 = vmatprep.subr.bf16.mxu1 %v664_v58 }
 0x192   : > { %v590_v62 = vpop.f32.mrb[25].mxu0 }
 0x193   : > { %v1191_v63 = vpop.f32.mrb[26].mxu0 }
 0x194   : > { %v666_v0 = vpack.c.bf16 %v1191_v63, %v1190_v61  ;;  %v593_v1 = vpop.f32.mrb[27].mxu0  ;;  %1091 = vmatpush3.bf16.msra.mxu1 %v656_v34 }
 0x195   : > { %v665_v2 = vpack.c.bf16 %v593_v1, %v590_v62 }
 0x197   : > { %1092 = vmatprep.subr.bf16.mxu1 %v665_v2 }
 0x198   : > { %1093 = vmatpush3.bf16.msra.mxu1 %v657_v42 }
 0x199   : > { %v1194_v3 = vpop.f32.mrb[28].mxu0  ;;  %1094 = vmatprep.subr.bf16.mxu1 %v666_v0 }
 0x19a   : > { %v606_v4 = vpop.f32.mrb[29].mxu0 }
 0x19b   : > { %v1195_v5 = vpop.f32.mrb[30].mxu0 }
 0x19c   : > { %v668_v6 = vpack.c.bf16 %v1195_v5, %v1194_v3  ;;  %v609_v7 = vpop.f32.mrb[31].mxu0  ;;  %1095 = vmatpush3.bf16.msra.mxu1 %v658_v40 }
 0x19d   : > { %v667_v8 = vpack.c.bf16 %v609_v7, %v606_v4 }
 0x19f   : > { %1096 = vmatprep.subr.bf16.mxu1 %v667_v8 }
 0x1a0   : > { %1097 = vmatpush3.bf16.msra.mxu1 %v659_v48 }
 0x1a1   : > { %1098 = vmatprep.subr.bf16.mxu1 %v668_v6 }
 0x1a4   : > { %1099 = vmatpush3.bf16.msra.mxu1 %v660_v46 }
 0x1a7   : > { %782 = vmatmul.mubr.bf16.vlgmr.msra.gmra.mrb[0].mxu1 %v1310_v9 }
 0x1a8   : > { %789 = vmatprep.mubr.bf16.mxu1 %v1313_v10 }
 0x1af   : > { %790 = vmatmul.mubr.bf16.gmra.mrb[4].mxu1 %v1315_v11 }
 0x1b0   : > { %797 = vmatprep.mubr.bf16.mxu1 %v1316_v12 }
 0x1b7   : > { %798 = vmatmul.mubr.bf16.gmra.mrb[8].mxu1 %v1318_v13 }
 0x1b8   : > { %805 = vmatprep.mubr.bf16.mxu1 %v1319_v14 }
 0x1bf   : > { %806 = vmatmul.mubr.bf16.gmra.mrb[12].mxu1 %v1321_v15 }
 0x1c0   : > { %813 = vmatprep.mubr.bf16.mxu1 %v1322_v16 }
 0x1c7   : > { %814 = vmatmul.mubr.bf16.gmra.mrb[16].mxu1 %v1324_v17 }
 0x1c8   : > { %821 = vmatprep.mubr.bf16.mxu1 %v1325_v18 }
 0x1cf   : > { %822 = vmatmul.mubr.bf16.gmra.mrb[20].mxu1 %v1327_v19 }
 0x1d0   : > { %829 = vmatprep.mubr.bf16.mxu1 %v1328_v20 }
 0x1d7   : > { %830 = vmatmul.mubr.bf16.gmra.mrb[24].mxu1 %v1330_v21 }
 0x1d8   : > { %837 = vmatprep.mubr.bf16.mxu1 %v1331_v22 }
 0x1df   : > { %838 = vmatmul.mubr.bf16.gmra.mrb[28].mxu1 %v1333_v23 }
 0x27a   : > { %v1100_v24 = vpop.f32.mrb[0].mxu1 }
 0x27b   : > { %v1101_v25 = vpop.f32.mrb[1].mxu1 }
 0x27c   : > { %v1102_v26 = vadd.f32 %v1101_v25, %v1100_v24  ;;  %v1103_v27 = vpop.f32.mrb[2].mxu1 }
 0x27d   : > { %v1104_v28 = vpop.f32.mrb[3].mxu1 }
 0x27e   : > { %v1105_v29 = vadd.f32 %v1104_v28, %v1103_v27  ;;  %862 = vst [vmem:[%s1760_s20] sm:$0xff] %v1102_v26 }
 0x280   : > { %863 = vst [vmem:[%s1760_s20 + $0x8] sm:$0xff] %v1105_v29 }
 0x282   : > { %v1106_v30 = vpop.f32.mrb[4].mxu1 }
 0x283   : > { %v1107_v31 = vpop.f32.mrb[5].mxu1 }
 0x284   : > { %v1108_v32 = vadd.f32 %v1107_v31, %v1106_v30  ;;  %v1109_v33 = vpop.f32.mrb[6].mxu1 }
 0x285   : > { %v1110_v34 = vpop.f32.mrb[7].mxu1 }
 0x286   : > { %v1111_v35 = vadd.f32 %v1110_v34, %v1109_v33  ;;  %864 = vst [vmem:[%s1760_s20 + $0x10] sm:$0xff] %v1108_v32 }
 0x288   : > { %865 = vst [vmem:[%s1760_s20 + $0x18] sm:$0xff] %v1111_v35 }
 0x28a   : > { %v1112_v36 = vpop.f32.mrb[8].mxu1 }
 0x28b   : > { %v1113_v37 = vpop.f32.mrb[9].mxu1 }
 0x28c   : > { %v1114_v38 = vadd.f32 %v1113_v37, %v1112_v36  ;;  %v1115_v39 = vpop.f32.mrb[10].mxu1 }
 0x28d   : > { %v1116_v40 = vpop.f32.mrb[11].mxu1 }
 0x28e   : > { %v1117_v41 = vadd.f32 %v1116_v40, %v1115_v39  ;;  %866 = vst [vmem:[%s1760_s20 + $0x20] sm:$0xff] %v1114_v38 }
 0x290   : > { %867 = vst [vmem:[%s1760_s20 + $0x28] sm:$0xff] %v1117_v41 }
 0x292   : > { %v1118_v42 = vpop.f32.mrb[12].mxu1 }
 0x293   : > { %v1119_v43 = vpop.f32.mrb[13].mxu1 }
 0x294   : > { %v1120_v44 = vadd.f32 %v1119_v43, %v1118_v42  ;;  %v1121_v45 = vpop.f32.mrb[14].mxu1 }
 0x295   : > { %v1122_v46 = vpop.f32.mrb[15].mxu1 }
 0x296   : > { %v1123_v47 = vadd.f32 %v1122_v46, %v1121_v45  ;;  %868 = vst [vmem:[%s1760_s20 + $0x30] sm:$0xff] %v1120_v44 }
 0x298   : > { %869 = vst [vmem:[%s1760_s20 + $0x38] sm:$0xff] %v1123_v47 }
 0x29a   : > { %v1124_v48 = vpop.f32.mrb[16].mxu1 }
 0x29b   : > { %v1125_v49 = vpop.f32.mrb[17].mxu1 }
 0x29c   : > { %v1126_v50 = vadd.f32 %v1125_v49, %v1124_v48  ;;  %v1127_v51 = vpop.f32.mrb[18].mxu1 }
 0x29d   : > { %v1128_v52 = vpop.f32.mrb[19].mxu1 }
 0x29e   : > { %v1129_v53 = vadd.f32 %v1128_v52, %v1127_v51  ;;  %870 = vst [vmem:[%s1760_s20 + $0x40] sm:$0xff] %v1126_v50 }
 0x2a0   : > { %871 = vst [vmem:[%s1760_s20 + $0x48] sm:$0xff] %v1129_v53 }
 0x2a2   : > { %v1130_v54 = vpop.f32.mrb[20].mxu1 }
 0x2a3   : > { %v1131_v55 = vpop.f32.mrb[21].mxu1 }
 0x2a4   : > { %v1132_v56 = vadd.f32 %v1131_v55, %v1130_v54  ;;  %v1133_v57 = vpop.f32.mrb[22].mxu1 }
 0x2a5   : > { %v1134_v58 = vpop.f32.mrb[23].mxu1 }
 0x2a6   : > { %v1135_v59 = vadd.f32 %v1134_v58, %v1133_v57  ;;  %872 = vst [vmem:[%s1760_s20 + $0x50] sm:$0xff] %v1132_v56 }
 0x2a8   : > { %873 = vst [vmem:[%s1760_s20 + $0x58] sm:$0xff] %v1135_v59 }
 0x2aa   : > { %v1136_v60 = vpop.f32.mrb[24].mxu1 }
 0x2ab   : > { %v1137_v61 = vpop.f32.mrb[25].mxu1 }
 0x2ac   : > { %v1138_v62 = vadd.f32 %v1137_v61, %v1136_v60  ;;  %v1139_v63 = vpop.f32.mrb[26].mxu1 }
 0x2ad   : > { %v1140_v0 = vpop.f32.mrb[27].mxu1 }
 0x2ae   : > { %v1141_v1 = vadd.f32 %v1140_v0, %v1139_v63  ;;  %874 = vst [vmem:[%s1760_s20 + $0x60] sm:$0xff] %v1138_v62 }
 0x2b0   : > { %875 = vst [vmem:[%s1760_s20 + $0x68] sm:$0xff] %v1141_v1 }
 0x2b2   : > { %v1142_v2 = vpop.f32.mrb[28].mxu1 }
 0x2b3   : > { %v1143_v3 = vpop.f32.mrb[29].mxu1 }
 0x2b4   : > { %v1144_v4 = vadd.f32 %v1143_v3, %v1142_v2  ;;  %v1145_v5 = vpop.f32.mrb[30].mxu1 }
 0x2b5   : > { %v1146_v6 = vpop.f32.mrb[31].mxu1 }
 0x2b6   : > { %v1147_v7 = vadd.f32 %v1146_v6, %v1145_v5  ;;  %876 = vst [vmem:[%s1760_s20 + $0x70] sm:$0xff] %v1144_v4 }
 0x2b8   : > { %877 = vst [vmem:[%s1760_s20 + $0x78] sm:$0xff] %v1147_v7 }
 0x2b9   : > { %1433 = shalt.err (!%p1430_p11)
}
 0x2ba   : > { %s1434_s21 = scalar_lea.hbm %s1781_s8, 2048  ;;  %s1438_s28 = scalar_lea.hbm %s1837_s3, 4096 }
 0x2bb   : > { %p1435_p0 = scmp.ne.s32.totalorder %s1781_s8, %s1434_s21  ;;  %p1439_p6 = scmp.lt.u32.totalorder %s1781_s8, %s1837_s3 }
 0x2bc   : > { %p1440_p7 = scmp.lt.u32.totalorder %s1438_s28, %s1434_s21  ;;  %p1442_p8 = scmp.lt.u32.totalorder %s1434_s21, %s1781_s8 }
 0x2bd   : > { %p1436_p4 = pnand %p1435_p0, %p1852_p12 }
 0x2be   : > { %p1441_p2 = por %p1440_p7, %p1439_p6 }
 0x2bf   : > { %p1437_p13 = pneg %p1436_p4 }
 0x2c0   : > { %p1443_p1 = por %p1442_p8, %p1441_p2 }
 0x2c2   : > { %p1444_p10 = pnand %p1443_p1, %p1437_p13 }
 0x2c4   : > { %1447 = shalt.err (!%p1444_p10)
}
 0x2c5   : > { %s1516_s20 = smov 128   ;;  %s1517_s22 = smov 8  }
 0x2c6   : > { %1206 = dma.vmem_to_hbm [thread:$0]  (%p1852_p12), %s1783_s24, 2048, %s1781_s8, %s879_s26, %s1516_s20, %s1516_s20, %s1517_s22  }
 0x2c7 PF: > { %s907_s6 = sand.u32 1, %s1486_s12   ;;  %p1853_p3 = scmp.ne.s32.totalorder %s1845_s23, 0 }
 0x2c8   : > { %p1854_p5 = scmp.ge.s32.totalorder %s1506_s17, 2  ;;  %s908_s7 = scalar_lea.sflag [#allocation4], %s907_s6 }
 0x2ca   : > { %p1220_p9 = pnand %p1854_p5, %p1853_p3 }
 0x2cc   : > { %1481 = dma.done.wait (!%p1220_p9), %s908_s7, 2048  }
 0x2cd   : > { %1483 = vsyncadd (!%p1220_p9), %s908_s7, 4294965248  ;;  %s20_s17 = sadd.s32 1, %s1506_s17   ;;  %s1855_s12 = smov %s1490_s13 }
 0x2ce   : > { %p17_p11 = scmp.ge.s32.totalorder %s20_s17, 4   ;;  %s1856_s13 = smov %s1494_s14 }
 0x2cf   : > { %s1857_s14 = smov %s1680_s18  ;;  %s1858_s15 = smov %s1502_s16 }
 0x2d0   : > { %s1859_s16 = smov %s1861_s19  ;;  %19 = sbr.rel (!%p17_p11) target bundleno = 7 (0x7), region = 90 }
 0x2d7   :  { %913 = vsyncpa [#allocation3], 1 }
 0x2d8   :  { %915 = vsyncpa [#allocation3 + $0x1], 1 }
 0x2d9   :  { %916 = vsyncpa [#allocation6], 1 }
 0x2da   :  { %917 = vsyncpa [#allocation4], 1 }
 0x2db   :  { %919 = vsyncpa [#allocation4 + $0x1], 1 }

</bundles_post_ra>
